<compile_context>
chip_gen: v6e
topology: v6e:2x2x1
jax: 0.10.0
libtpu: 0.0.40
codegen_flags: <defaults>
</compile_context>

<pallas_src>
import jax
import jax.numpy as jnp
from jax import lax
from jax.experimental import pallas as pl
from jax.experimental.pallas import tpu as pltpu


def _round_up(x, m):
    return ((x + m - 1) // m) * m


def _linear_kernel(x_ref, w_ref, b_ref, o_ref, acc_ref):
    """One (i, j, k) grid step of y = x @ w.T + b.

    x_ref  : (TM, TK)  activation tile
    w_ref  : (TN, TK)  weight tile in PyTorch Linear layout [v, h] (no transpose)
    b_ref  : (1,  TN)  bias tile (tracks only the N grid axis)
    o_ref  : (TM, TN)  output tile (same block across K -> resident)
    acc_ref: (TM, TN)  f32 accumulator scratch
    """
    k = pl.program_id(2)

    @pl.when(k == 0)
    def _init():
        acc_ref[...] = jnp.zeros_like(acc_ref)

    # Contract x's feature dim against w's feature dim: x[TM,TK] . w[TN,TK]^T
    # on the MXU, without materializing a transposed weight.
    acc_ref[...] += lax.dot_general(
        x_ref[...], w_ref[...],
        dimension_numbers=(((1,), (1,)), ((), ())),
        preferred_element_type=jnp.float32)

    @pl.when(k == pl.num_programs(2) - 1)
    def _epilogue():
        acc = acc_ref[...] + b_ref[...].astype(jnp.float32)
        o_ref[...] = acc.astype(o_ref.dtype)


def prediction_forward(x, w, b, *, tm=256, tn=512, tk=512):
    """Pallas equivalent of nn.Linear(h, v): y = x @ w.T + b.

    x: [..., h]   w: [v, h] (PyTorch Linear weight layout)   b: [v]
    returns [..., v]
    """
    out_dtype = x.dtype
    h = x.shape[-1]
    v = w.shape[0]
    lead_shape = x.shape[:-1]
    m = 1
    for d in lead_shape:
        m *= d

    x2d = x.reshape(m, h)
    b2d = b.reshape(1, v)

    # Clamp target tiles to the hardware-aligned problem size.
    tm = min(tm, _round_up(m, 8))      # sublane-aligned rows
    tn = min(tn, _round_up(v, 128))    # lane-dense output columns
    tk = min(tk, _round_up(h, 128))    # lane-aligned contraction dim

    m_pad = _round_up(m, tm)
    v_pad = _round_up(v, tn)
    h_pad = _round_up(h, tk)

    # Zero-pad so every block divides evenly; padded K contributes 0 to the dot
    # and padded M rows / N columns are sliced away below.
    if (m_pad, h_pad) != (m, h):
        x2d = jnp.pad(x2d, ((0, m_pad - m), (0, h_pad - h)))
    if (v_pad, h_pad) != (v, h):
        w = jnp.pad(w, ((0, v_pad - v), (0, h_pad - h)))
    if v_pad != v:
        b2d = jnp.pad(b2d, ((0, 0), (0, v_pad - v)))

    grid = (m_pad // tm, v_pad // tn, h_pad // tk)

    bytes_per = jnp.dtype(out_dtype).itemsize
    cost = pl.CostEstimate(
        flops=2 * m_pad * h_pad * v_pad,
        transcendentals=0,
        bytes_accessed=(m_pad * h_pad + v_pad * h_pad + v_pad
                        + m_pad * v_pad) * bytes_per,
    )

    out2d = pl.pallas_call(
        _linear_kernel,
        out_shape=jax.ShapeDtypeStruct((m_pad, v_pad), out_dtype),
        grid_spec=pltpu.PrefetchScalarGridSpec(
            num_scalar_prefetch=0,
            grid=grid,
            in_specs=[
                pl.BlockSpec((tm, tk), lambda i, j, k: (i, k)),   # x tile
                pl.BlockSpec((tn, tk), lambda i, j, k: (j, k)),   # w tile ([v, h] layout)
                pl.BlockSpec((1, tn), lambda i, j, k: (0, j)),    # bias tile (N only)
            ],
            out_specs=pl.BlockSpec((tm, tn), lambda i, j, k: (i, j)),
            scratch_shapes=[pltpu.VMEM((tm, tn), jnp.float32)],
        ),
        compiler_params=pltpu.CompilerParams(
            dimension_semantics=("parallel", "parallel", "arbitrary"),
            vmem_limit_bytes=32 * 1024 * 1024,
        ),
        cost_estimate=cost,
    )(x2d, w, b2d)

    out2d = out2d[:m, :v]
    return out2d.reshape(*lead_shape, v)


if __name__ == "__main__":
    # Module config: Prediction(h, v)
    batch, seq, h, v = 2, 8, 32, 64

    key = jax.random.PRNGKey(0)
    kx, kw, kb = jax.random.split(key, 3)

    # Deterministic synthetic parameters (same shapes as nn.Linear(h, v))
    x = jax.random.normal(kx, (batch, seq, h), dtype=jnp.float32)
    w = jax.random.normal(kw, (v, h), dtype=jnp.float32) * 0.05   # weight [v, h]
    b = jax.random.normal(kb, (v,), dtype=jnp.float32) * 0.05     # bias   [v]

    y = prediction_forward(x, w, b)
    y = jax.block_until_ready(y)

    # Reference check against plain JAX (same math as torch.nn.Linear)
    y_ref = x @ w.T + b
    assert y.shape == (batch, seq, v)
    assert jnp.allclose(y, y_ref, atol=1e-5, rtol=1e-5)

    print("KERNEL_OK")
</pallas_src>

<mosaic_0001>
module attributes {stable_mosaic.version = 11 : i64} {
  func.func @_linear_kernel(%arg0: i32, %arg1: i32, %arg2: i32, %arg3: memref<16x128xf32, #tpu.memory_space<vmem>>, %arg4: memref<128x128xf32, #tpu.memory_space<vmem>>, %arg5: memref<1x128xf32, #tpu.memory_space<vmem>>, %arg6: memref<16x128xf32, #tpu.memory_space<vmem>>, %arg7: memref<16x128xf32, #tpu.memory_space<vmem>>) attributes {dimension_semantics = [#tpu.dimension_semantics<parallel>, #tpu.dimension_semantics<parallel>, #tpu.dimension_semantics<arbitrary>], iteration_bounds = array<i64: 1, 1, 1>, scalar_prefetch = 0 : i64, scratch_operands = 1 : i64, tpu.core_type = #tpu.core_type<tc>, window_params = [{transform_indices = @transform_0, window_bounds = array<i64: 16, 128>}, {transform_indices = @transform_1, window_bounds = array<i64: 128, 128>}, {transform_indices = @transform_2, window_bounds = array<i64: 1, 128>}, {transform_indices = @transform_3, window_bounds = array<i64: 16, 128>}]} {
    %c0_i32 = arith.constant 0 : i32
    %0 = arith.cmpi eq, %arg2, %c0_i32 : i32
    %1 = arith.extui %0 : i1 to i32
    %c0_i32_0 = arith.constant 0 : i32
    %2 = arith.cmpi ne, %1, %c0_i32_0 : i32
    scf.if %2 {
      %cst_10 = arith.constant 0.000000e+00 : f32
      %12 = vector.broadcast %cst_10 : f32 to vector<16x128xf32>
      %c0_11 = arith.constant 0 : index
      %c0_12 = arith.constant 0 : index
      %13 = vector.load %arg7[%c0_11, %c0_12] : memref<16x128xf32, #tpu.memory_space<vmem>>, vector<16x128xf32>
      tpu.vector_store %arg7[%c0_11, %c0_12], %12 {strides = array<i32>} : memref<16x128xf32, #tpu.memory_space<vmem>>, vector<16x128xf32>,
    } else {
    }
    %c0 = arith.constant 0 : index
    %c0_1 = arith.constant 0 : index
    %3 = vector.load %arg7[%c0, %c0_1] : memref<16x128xf32, #tpu.memory_space<vmem>>, vector<16x128xf32>
    %c0_2 = arith.constant 0 : index
    %c0_3 = arith.constant 0 : index
    %4 = vector.load %arg3[%c0_2, %c0_3] : memref<16x128xf32, #tpu.memory_space<vmem>>, vector<16x128xf32>
    %c0_4 = arith.constant 0 : index
    %c0_5 = arith.constant 0 : index
    %5 = vector.load %arg4[%c0_4, %c0_5] : memref<128x128xf32, #tpu.memory_space<vmem>>, vector<128x128xf32>
    %cst = arith.constant dense<0.000000e+00> : vector<16x128xf32>
    %6 = tpu.matmul %4, %5, %cst {dimension_numbers = #tpu.dot_dimension_numbers<[1], [1], [0], [0], [0, 0, 1, 0], [], []>} : vector<16x128xf32>, vector<128x128xf32>, vector<16x128xf32> -> vector<16x128xf32>
    %7 = arith.addf %3, %6 : vector<16x128xf32>
    %c0_6 = arith.constant 0 : index
    %c0_7 = arith.constant 0 : index
    %8 = vector.load %arg7[%c0_6, %c0_7] : memref<16x128xf32, #tpu.memory_space<vmem>>, vector<16x128xf32>
    tpu.vector_store %arg7[%c0_6, %c0_7], %7 {strides = array<i32>} : memref<16x128xf32, #tpu.memory_space<vmem>>, vector<16x128xf32>,
    %c0_i32_8 = arith.constant 0 : i32
    %9 = arith.cmpi eq, %arg2, %c0_i32_8 : i32
    %10 = arith.extui %9 : i1 to i32
    %c0_i32_9 = arith.constant 0 : i32
    %11 = arith.cmpi ne, %10, %c0_i32_9 : i32
    scf.if %11 {
      %c0_10 = arith.constant 0 : index
      %c0_11 = arith.constant 0 : index
      %12 = vector.load %arg7[%c0_10, %c0_11] : memref<16x128xf32, #tpu.memory_space<vmem>>, vector<16x128xf32>
      %c0_12 = arith.constant 0 : index
      %c0_13 = arith.constant 0 : index
      %13 = vector.load %arg5[%c0_12, %c0_13] : memref<1x128xf32, #tpu.memory_space<vmem>>, vector<1x128xf32>
      %14 = vector.broadcast %13 : vector<1x128xf32> to vector<16x128xf32>
      %15 = arith.addf %12, %14 : vector<16x128xf32>
      %c0_14 = arith.constant 0 : index
      %c0_15 = arith.constant 0 : index
      %16 = vector.load %arg6[%c0_14, %c0_15] : memref<16x128xf32, #tpu.memory_space<vmem>>, vector<16x128xf32>
      tpu.vector_store %arg6[%c0_14, %c0_15], %15 {strides = array<i32>} : memref<16x128xf32, #tpu.memory_space<vmem>>, vector<16x128xf32>,
    } else {
    }
    return
  }
  func.func @transform_0(%arg0: i32, %arg1: i32, %arg2: i32) -> (i32, i32) {
    %c0_i32 = arith.constant 0 : i32
    return %arg0, %arg2 : i32, i32
  }
  func.func @transform_1(%arg0: i32, %arg1: i32, %arg2: i32) -> (i32, i32) {
    %c0_i32 = arith.constant 0 : i32
    return %arg1, %arg2 : i32, i32
  }
  func.func @transform_2(%arg0: i32, %arg1: i32, %arg2: i32) -> (i32, i32) {
    %c0_i32 = arith.constant 0 : i32
    %c0_i32_0 = arith.constant 0 : i32
    return %c0_i32, %arg1 : i32, i32
  }
  func.func @transform_3(%arg0: i32, %arg1: i32, %arg2: i32) -> (i32, i32) {
    %c0_i32 = arith.constant 0 : i32
    return %arg0, %arg1 : i32, i32
  }
}

</mosaic_0001>

<bundles_post_ra>
// kernel: tpu_custom_call.1
= control target key start
LH: loop header
LB: loop body
LE: loop exit
PB: predicated region body
PF: predicated region fallthrough
CT: control target
= control target key end

     0   :  { %8 = vsyncpa [#allocation4], 0  ;;  %s353_s0 = inlined_call_operand.hbm [shape: f32[16,128], index: 0, kind: input, shape index: {}]   ;;  %s354_s1 = inlined_call_operand.hbm [shape: f32[128,128], index: 1, kind: input, shape index: {}]   ;;  %s355_s2 = inlined_call_operand.vmem [shape: f32[1,128], index: 2, kind: input, shape index: {}]   ;;  %s356_s3 = inlined_call_operand.hbm [shape: f32[16,128], index: 3, kind: output, shape index: {}]  }
   0x1   :  { %9 = vsyncpa [#allocation7], 0 }
   0x2   :  { %10 = vsyncpa [#allocation5], 0  ;;  %s307_s12 = smov [#allocation3]  }
   0x3   :  { %s16_s13 = sshll.u32 %s307_s12, 4  ;;  %s17_s13 = int_to_ptr.vmem [resolvable:$true] %s16_s13 }
   0x4   :  { %s249_s14 = scalar_lea.vmem %s17_s13, 256  ;;  %p254_p1 = scmp.lt.s32.totalorder %s17_s13, %s17_s13 }
   0x5   :  { %p250_p0 = scmp.ne.s32.totalorder %s17_s13, %s249_s14  ;;  %p255_p2 = scmp.lt.s32.totalorder %s249_s14, %s249_s14 }
   0x7   :  { %p256_p3 = por %p255_p2, %p254_p1 }
   0x9   :  { %p257_p4 = pnand %p256_p3, %p250_p0 }
   0xb   :  { %260 = shalt.err (!%p257_p4)
}
   0xc   :  { %s308_s15 = smov 128   ;;  %s309_s16 = smov 8  }
   0xd   :  { %22 = dma.hbm_to_vmem [thread:$0]  %s353_s0, 256, %s17_s13, [#allocation4], %s308_s15, %s308_s15, %s309_s16  }
   0xe   :  { %s310_s19 = smov [#allocation6]  }
   0xf   :  { %s28_s20 = sshll.u32 %s310_s19, 4  ;;  %s29_s20 = int_to_ptr.vmem [resolvable:$true] %s28_s20 }
  0x10   :  { %s269_s21 = scalar_lea.vmem %s29_s20, 2048  ;;  %p274_p6 = scmp.lt.s32.totalorder %s29_s20, %s29_s20 }
  0x11   :  { %p270_p5 = scmp.ne.s32.totalorder %s29_s20, %s269_s21  ;;  %p275_p7 = scmp.lt.s32.totalorder %s269_s21, %s269_s21 }
  0x13   :  { %p276_p8 = por %p275_p7, %p274_p6 }
  0x15   :  { %p277_p9 = pnand %p276_p8, %p270_p5 }
  0x17   :  { %280 = shalt.err (!%p277_p9)
}
  0x18   :  { %34 = dma.hbm_to_vmem [thread:$0]  %s354_s1, 2048, %s29_s20, [#allocation7], %s308_s15, %s308_s15, %s309_s16  }
  0x19   :  { %301 = dma.done.wait [#allocation4], 256  }
  0x1a   :  { %302 = vsyncadd [#allocation4], 4294967040 }
  0x1b   :  { %303 = dma.done.wait [#allocation7], 2048  }
  0x1c   :  { %304 = vsyncadd [#allocation7], 4294965248  ;;  %v68_v0 = vld [vmem:[#allocation6 + $0x78] sm:$0xff]  ;;  %v67_v1 = vld [vmem:[#allocation6 + $0x70] sm:$0xff]  ;;  %s311_s24 = smov [#allocation8]  }
  0x1d   :  { %201 = vmatprep.subr.mxu0 %v68_v0  ;;  %v66_v2 = vld [vmem:[#allocation6 + $0x68] sm:$0xff]  ;;  %v51_v3 = vld [vmem:[#allocation3] sm:$0xff]  ;;  %v65_v4 = vld [vmem:[#allocation6 + $0x60] sm:$0xff]  ;;  %s169_s25 = sshll.u32 %s311_s24, 4  ;;  %s170_s25 = int_to_ptr.vmem [resolvable:$true] %s169_s25 }
  0x1e   :  { %202 = vmatpush3.xpose.msra.mxu0 %v68_v0  ;;  %233 = vmatprep.mubr.f32.mxu0 %v51_v3  ;;  %v64_v5 = vld [vmem:[#allocation6 + $0x58] sm:$0xff]  ;;  %v63_v6 = vld [vmem:[#allocation6 + $0x50] sm:$0xff]  ;;  %v62_v7 = vld [vmem:[#allocation6 + $0x48] sm:$0xff]  ;;  %s281_s26 = scalar_lea.vmem %s170_s25, 256  ;;  %p286_p11 = scmp.lt.s32.totalorder %s170_s25, %s170_s25 }
  0x1f   :  { %203 = vmatprep.subr.mxu0 %v67_v1  ;;  %v61_v8 = vld [vmem:[#allocation6 + $0x40] sm:$0xff]  ;;  %v60_v9 = vld [vmem:[#allocation6 + $0x38] sm:$0xff]  ;;  %v59_v10 = vld [vmem:[#allocation6 + $0x30] sm:$0xff]  ;;  %p282_p10 = scmp.ne.s32.totalorder %s170_s25, %s281_s26  ;;  %p287_p12 = scmp.lt.s32.totalorder %s281_s26, %s281_s26 }
  0x20   :  { %v58_v11 = vld [vmem:[#allocation6 + $0x28] sm:$0xff]  ;;  %v57_v12 = vld [vmem:[#allocation6 + $0x20] sm:$0xff]  ;;  %v56_v13 = vld [vmem:[#allocation6 + $0x18] sm:$0xff] }
  0x21   :  { %v55_v14 = vld [vmem:[#allocation6 + $0x10] sm:$0xff]  ;;  %v54_v15 = vld [vmem:[#allocation6 + $0x8] sm:$0xff]  ;;  %v53_v16 = vld [vmem:[#allocation6] sm:$0xff]  ;;  %p288_p13 = por %p287_p12, %p286_p11 }
  0x22   :  { %204 = vmatpush3.xpose.msra.mxu0 %v67_v1  ;;  %v52_v17 = vld [vmem:[#allocation3 + $0x8] sm:$0xff]  ;;  %v182_v18 = vld [vmem:[%s355_s2] ss:$0 sm:$0xff] }
  0x23   :  { %205 = vmatprep.subr.mxu0 %v66_v2  ;;  %p289_p0 = pnand %p288_p13, %p282_p10 }
  0x26   :  { %206 = vmatpush3.xpose.msra.mxu0 %v66_v2 }
  0x27   :  { %207 = vmatprep.subr.mxu0 %v65_v4 }
  0x2a   :  { %208 = vmatpush3.xpose.msra.mxu0 %v65_v4 }
  0x2b   :  { %209 = vmatprep.subr.mxu0 %v64_v5 }
  0x2e   :  { %210 = vmatpush3.xpose.msra.mxu0 %v64_v5 }
  0x2f   :  { %211 = vmatprep.subr.mxu0 %v63_v6 }
  0x32   :  { %212 = vmatpush3.xpose.msra.mxu0 %v63_v6 }
  0x33   :  { %213 = vmatprep.subr.mxu0 %v62_v7 }
  0x36   :  { %214 = vmatpush3.xpose.msra.mxu0 %v62_v7 }
  0x37   :  { %215 = vmatprep.subr.mxu0 %v61_v8 }
  0x3a   :  { %216 = vmatpush3.xpose.msra.mxu0 %v61_v8 }
  0x3b   :  { %217 = vmatprep.subr.mxu0 %v60_v9 }
  0x3e   :  { %218 = vmatpush3.xpose.msra.mxu0 %v60_v9 }
  0x3f   :  { %219 = vmatprep.subr.mxu0 %v59_v10 }
  0x42   :  { %220 = vmatpush3.xpose.msra.mxu0 %v59_v10 }
  0x43   :  { %221 = vmatprep.subr.mxu0 %v58_v11 }
  0x46   :  { %222 = vmatpush3.xpose.msra.mxu0 %v58_v11 }
  0x47   :  { %223 = vmatprep.subr.mxu0 %v57_v12 }
  0x4a   :  { %224 = vmatpush3.xpose.msra.mxu0 %v57_v12 }
  0x4b   :  { %225 = vmatprep.subr.mxu0 %v56_v13 }
  0x4e   :  { %226 = vmatpush3.xpose.msra.mxu0 %v56_v13 }
  0x4f   :  { %227 = vmatprep.subr.mxu0 %v55_v14 }
  0x52   :  { %228 = vmatpush3.xpose.msra.mxu0 %v55_v14 }
  0x53   :  { %229 = vmatprep.subr.mxu0 %v54_v15 }
  0x56   :  { %230 = vmatpush3.xpose.msra.mxu0 %v54_v15 }
  0x57   :  { %231 = vmatprep.subr.mxu0 %v53_v16 }
  0x5a   :  { %232 = vmatpush3.xpose.msra.mxu0 %v53_v16 }
  0x5d   :  { %234 = vmatmul.mubr.f32.vlgmr.msra.gmra.mxu0 %v52_v17 }
 0x11d   :  { %v235_v19 = vpop.f32.mrf.mxu0 }
 0x11e   :  { %v161_v20 = vadd.f32 %v235_v19, %v182_v18 }
 0x11f   :  { %v135_v21 = vpop.f32.mrf.mxu0 }
 0x120   :  { %163 = vst [vmem:[#allocation8 + $0x8] sm:$0xff] %v161_v20  ;;  %v160_v22 = vadd.f32 %v182_v18, %v135_v21 }
 0x122   :  { %162 = vst [vmem:[#allocation8] sm:$0xff] %v160_v22 }
 0x123   :  { %292 = shalt.err (!%p289_p0)
}
 0x124   :  { %175 = dma.vmem_to_hbm [thread:$0]  %s170_s25, 256, %s356_s3, [#allocation5], %s308_s15, %s308_s15, %s309_s16  }
 0x125   :  { %305 = dma.done.wait [#allocation5], 256  }
 0x126   :  { %306 = vsyncadd [#allocation5], 4294967040 }
 0x127   :  { %179 = vsyncpa [#allocation4], 1 }
 0x128   :  { %180 = vsyncpa [#allocation7], 1 }
 0x129   :  { %181 = vsyncpa [#allocation5], 1 }

</bundles_post_ra>
